<compile_context>
chip_gen: v6e
topology: v6e:2x2x1
jax: 0.10.0
libtpu: 0.0.40
codegen_flags: <defaults>
</compile_context>

<pallas_src>
import math
import operator
from functools import reduce

import jax
import jax.numpy as jnp
from jax.experimental import pallas as pl
from jax.experimental.pallas import tpu as pltpu


def _make_attn_kernel(key_size):
    scale = 1.0 / math.sqrt(key_size)

    def attn_kernel(q_ref, k_ref, v_ref, m_ref, out_ref, score_ref):
        q = q_ref[...]          # (G, TQ, Dk)
        k = k_ref[...]          # (G, Lk, Dk)
        v = v_ref[...]          # (G, Lk, Dv)
        m = m_ref[...]          # (G, TQ, Lk) int8 (0 / 1)

        # Batched QK^T: contraction on the trailing dim feeds the MXU directly
        # (no transposed VMEM copy), f32 accumulation.
        s = jnp.einsum("gqd,gkd->gqk", q, k,
                       preferred_element_type=jnp.float32) * scale

        # masked_fill_(mask, 0.0): masked positions become 0.0 BEFORE softmax.
        s = jnp.where(m != 0, jnp.float32(0.0), s)

        # Numerically-stable softmax over the key axis, all math in f32.
        s_max = jnp.max(s, axis=-1, keepdims=True)
        e = jnp.exp(s - s_max)
        denom = jnp.sum(e, axis=-1, keepdims=True)
        # exact reciprocal (approx=True would risk the 1e-5 tolerance)
        p = e * pl.reciprocal(denom, approx=False)

        score_ref[...] = p.astype(score_ref.dtype)
        out_ref[...] = jnp.einsum("gqk,gkd->gqd", p.astype(v.dtype), v,
                                  preferred_element_type=jnp.float32
                                  ).astype(out_ref.dtype)

    return attn_kernel


def scaled_dot_product_attention(query, key, value, mask, key_size):
    """query: (..., Lq, Dk), key: (..., Lk, Dk), value: (..., Lk, Dv),
    mask: (..., Lq, Lk) boolean.  Returns (result, score)."""
    *lead, Lq, Dk = query.shape
    Lk = key.shape[-2]
    Dv = value.shape[-1]
    BH = int(reduce(operator.mul, lead, 1))
    out_dtype = query.dtype

    # Keep Q/K/V in their native dtype (no f32 upcast); mask travels as int8.
    q = query.reshape(BH, Lq, Dk)
    k = key.reshape(BH, Lk, Dk)
    v = value.reshape(BH, Lk, Dv)
    m = mask.reshape(BH, Lq, Lk).astype(jnp.int8)

    # --- Lq tile (bounds per-step VMEM; softmax is per-row so tiling is exact).
    if Lq <= 512:
        TQ = Lq
    else:
        TQ = Lq
        for cand in range(512, 7, -8):          # multiple of 8 for (8,128) rule
            if Lq % cand == 0:
                TQ = cand
                break
    n_q_blocks = Lq // TQ

    # --- how many (batch*head) slices per grid step, from a VMEM budget.
    itm = jnp.dtype(q.dtype).itemsize
    out_itm = jnp.dtype(out_dtype).itemsize
    per_bh_bytes = ((TQ * Dk + Lk * Dk + Lk * Dv) * itm
                    + TQ * Lk * 1                 # int8 mask
                    + TQ * Dv * out_itm           # output tile
                    + TQ * Lk * out_itm)          # score tile
    budget = 24 * 1024 * 1024                     # double-buffered working set
    G = 1
    for d in range(1, BH + 1):
        if BH % d == 0 and 2 * d * per_bh_bytes <= budget:
            G = d
    # Keep the leading parallel grid axis >= 2 when possible (v7x has 2 TCs).
    if G == BH and BH >= 2:
        divs = [d for d in range(1, BH) if BH % d == 0]
        if divs:
            G = divs[-1]
    n_bh_blocks = BH // G

    block_bytes = G * per_bh_bytes
    vmem_limit = int(min(max(2 * block_bytes + (8 << 20), 32 << 20), 64 << 20))

    flops = 2 * BH * Lq * Lk * Dk + 2 * BH * Lq * Lk * Dv
    bytes_accessed = ((q.size + k.size + v.size) * itm + m.size
                      + (BH * Lq * Dv + BH * Lq * Lk) * out_itm)
    cost = pl.CostEstimate(flops=flops,
                           transcendentals=BH * Lq * Lk,
                           bytes_accessed=int(bytes_accessed))

    kernel = _make_attn_kernel(key_size)

    out, score = pl.pallas_call(
        kernel,
        out_shape=(
            jax.ShapeDtypeStruct((BH, Lq, Dv), out_dtype),
            jax.ShapeDtypeStruct((BH, Lq, Lk), out_dtype),
        ),
        grid_spec=pltpu.PrefetchScalarGridSpec(
            num_scalar_prefetch=0,
            grid=(n_bh_blocks, n_q_blocks),
            in_specs=[
                pl.BlockSpec((G, TQ, Dk), lambda i, qi: (i, qi, 0)),
                pl.BlockSpec((G, Lk, Dk), lambda i, qi: (i, 0, 0)),
                pl.BlockSpec((G, Lk, Dv), lambda i, qi: (i, 0, 0)),
                pl.BlockSpec((G, TQ, Lk), lambda i, qi: (i, qi, 0)),
            ],
            out_specs=[
                pl.BlockSpec((G, TQ, Dv), lambda i, qi: (i, qi, 0)),
                pl.BlockSpec((G, TQ, Lk), lambda i, qi: (i, qi, 0)),
            ],
        ),
        compiler_params=pltpu.CompilerParams(
            dimension_semantics=("parallel", "parallel"),
            vmem_limit_bytes=vmem_limit,
        ),
        cost_estimate=cost,
    )(q, k, v, m)

    return out.reshape(*lead, Lq, Dv), score.reshape(*lead, Lq, Lk)


def _reference(query, key, value, mask, key_size):
    s = jnp.einsum("bhqd,bhkd->bhqk", query, key) / math.sqrt(key_size)
    s = jnp.where(mask, 0.0, s)
    p = jax.nn.softmax(s, axis=-1)
    out = jnp.einsum("bhqk,bhkd->bhqd", p, value)
    return out, p


if __name__ == "__main__":
    # Small shapes consistent with the module's forward signature.
    batch, n_head, len_q, len_k, key_size, value_size = 2, 2, 8, 8, 32, 32

    rng = jax.random.PRNGKey(0)
    kq, kk, kv, km = jax.random.split(rng, 4)
    query = jax.random.normal(kq, (batch, n_head, len_q, key_size), dtype=jnp.float32)
    key = jax.random.normal(kk, (batch, n_head, len_k, key_size), dtype=jnp.float32)
    value = jax.random.normal(kv, (batch, n_head, len_k, value_size), dtype=jnp.float32)
    mask = jax.random.bernoulli(km, p=0.3, shape=(batch, n_head, len_q, len_k))

    result, score = scaled_dot_product_attention(query, key, value, mask, key_size)
    jax.block_until_ready((result, score))

    ref_result, ref_score = _reference(query, key, value, mask, key_size)
    assert jnp.allclose(result, ref_result, atol=1e-5, rtol=1e-5), "result mismatch"
    assert jnp.allclose(score, ref_score, atol=1e-5, rtol=1e-5), "score mismatch"

    print("KERNEL_OK")
</pallas_src>

<mosaic_0001>
module attributes {stable_mosaic.version = 11 : i64} {
  func.func @attn_kernel(%arg0: i32, %arg1: i32, %arg2: memref<2x8x32xf32, #tpu.memory_space<vmem>>, %arg3: memref<2x8x32xf32, #tpu.memory_space<vmem>>, %arg4: memref<2x8x32xf32, #tpu.memory_space<vmem>>, %arg5: memref<2x8x8xi8, #tpu.memory_space<vmem>>, %arg6: memref<2x8x32xf32, #tpu.memory_space<vmem>>, %arg7: memref<2x8x8xf32, #tpu.memory_space<vmem>>) attributes {dimension_semantics = [#tpu.dimension_semantics<parallel>, #tpu.dimension_semantics<parallel>], iteration_bounds = array<i64: 2, 1>, scalar_prefetch = 0 : i64, scratch_operands = 0 : i64, tpu.core_type = #tpu.core_type<tc>, window_params = [{transform_indices = @transform_0, window_bounds = array<i64: 2, 8, 32>}, {transform_indices = @transform_1, window_bounds = array<i64: 2, 8, 32>}, {transform_indices = @transform_2, window_bounds = array<i64: 2, 8, 32>}, {transform_indices = @transform_3, window_bounds = array<i64: 2, 8, 8>}, {transform_indices = @transform_4, window_bounds = array<i64: 2, 8, 32>}, {transform_indices = @transform_5, window_bounds = array<i64: 2, 8, 8>}]} {
    %c0 = arith.constant 0 : index
    %c0_0 = arith.constant 0 : index
    %c0_1 = arith.constant 0 : index
    %0 = vector.load %arg2[%c0, %c0_0, %c0_1] : memref<2x8x32xf32, #tpu.memory_space<vmem>>, vector<2x8x32xf32>
    %c0_2 = arith.constant 0 : index
    %c0_3 = arith.constant 0 : index
    %c0_4 = arith.constant 0 : index
    %1 = vector.load %arg3[%c0_2, %c0_3, %c0_4] : memref<2x8x32xf32, #tpu.memory_space<vmem>>, vector<2x8x32xf32>
    %c0_5 = arith.constant 0 : index
    %c0_6 = arith.constant 0 : index
    %c0_7 = arith.constant 0 : index
    %2 = vector.load %arg4[%c0_5, %c0_6, %c0_7] : memref<2x8x32xf32, #tpu.memory_space<vmem>>, vector<2x8x32xf32>
    %c0_8 = arith.constant 0 : index
    %c0_9 = arith.constant 0 : index
    %c0_10 = arith.constant 0 : index
    %3 = vector.load %arg5[%c0_8, %c0_9, %c0_10] : memref<2x8x8xi8, #tpu.memory_space<vmem>>, vector<2x8x8xi8>
    "tpu.trace_start"() <{level = 10 : i32, message = "gqd,gkd->gqk"}> : () -> ()
    %cst = arith.constant dense<0.000000e+00> : vector<2x8x8xf32>
    %4 = tpu.matmul %0, %1, %cst {dimension_numbers = #tpu.dot_dimension_numbers<[2], [2], [1], [1], [0, 0, 0, 1, 1, 1], [0], [0]>} : vector<2x8x32xf32>, vector<2x8x32xf32>, vector<2x8x8xf32> -> vector<2x8x8xf32>
    "tpu.trace_stop"() : () -> ()
    %cst_11 = arith.constant 0.176776692 : f32
    %5 = vector.broadcast %cst_11 : f32 to vector<2x8x8xf32>
    %6 = arith.mulf %4, %5 : vector<2x8x8xf32>
    %c0_i8 = arith.constant 0 : i8
    %7 = vector.broadcast %c0_i8 : i8 to vector<2x8x8xi8>
    %8 = arith.cmpi ne, %3, %7 : vector<2x8x8xi8>
    %cst_12 = arith.constant 0.000000e+00 : f32
    %9 = vector.broadcast %cst_12 : f32 to vector<2x8x8xf32>
    %10 = arith.select %8, %9, %6 : vector<2x8x8xi1>, vector<2x8x8xf32>
    %cst_13 = arith.constant dense<0xFF800000> : vector<2x8xf32>
    %11 = vector.multi_reduction <maximumf>, %10, %cst_13 [2] : vector<2x8x8xf32> to vector<2x8xf32>
    %12 = vector.shape_cast %11 : vector<2x8xf32> to vector<2x8x1xf32>
    %13 = vector.broadcast %12 : vector<2x8x1xf32> to vector<2x8x8xf32>
    %14 = arith.subf %10, %13 : vector<2x8x8xf32>
    %15 = math.exp %14 : vector<2x8x8xf32>
    %cst_14 = arith.constant dense<0.000000e+00> : vector<2x8xf32>
    %16 = vector.multi_reduction <add>, %15, %cst_14 [2] : vector<2x8x8xf32> to vector<2x8xf32>
    %17 = vector.shape_cast %16 : vector<2x8xf32> to vector<2x8x1xf32>
    %18 = tpu.reciprocal %17 : vector<2x8x1xf32> -> vector<2x8x1xf32>
    %19 = vector.broadcast %18 : vector<2x8x1xf32> to vector<2x8x8xf32>
    %20 = arith.mulf %15, %19 : vector<2x8x8xf32>
    %c0_15 = arith.constant 0 : index
    %c0_16 = arith.constant 0 : index
    %c0_17 = arith.constant 0 : index
    %21 = vector.load %arg7[%c0_15, %c0_16, %c0_17] : memref<2x8x8xf32, #tpu.memory_space<vmem>>, vector<2x8x8xf32>
    tpu.vector_store %arg7[%c0_15, %c0_16, %c0_17], %20 {strides = array<i32>} : memref<2x8x8xf32, #tpu.memory_space<vmem>>, vector<2x8x8xf32>,
    "tpu.trace_start"() <{level = 10 : i32, message = "gqk,gkd->gqd"}> : () -> ()
    %cst_18 = arith.constant dense<0.000000e+00> : vector<2x8x32xf32>
    %22 = tpu.matmul %20, %2, %cst_18 {dimension_numbers = #tpu.dot_dimension_numbers<[2], [1], [1], [2], [0, 0, 0, 1, 1, 2], [0], [0]>} : vector<2x8x8xf32>, vector<2x8x32xf32>, vector<2x8x32xf32> -> vector<2x8x32xf32>
    "tpu.trace_stop"() : () -> ()
    %c0_19 = arith.constant 0 : index
    %c0_20 = arith.constant 0 : index
    %c0_21 = arith.constant 0 : index
    %23 = vector.load %arg6[%c0_19, %c0_20, %c0_21] : memref<2x8x32xf32, #tpu.memory_space<vmem>>, vector<2x8x32xf32>
    tpu.vector_store %arg6[%c0_19, %c0_20, %c0_21], %22 {strides = array<i32>} : memref<2x8x32xf32, #tpu.memory_space<vmem>>, vector<2x8x32xf32>,
    return
  }
  func.func @transform_0(%arg0: i32, %arg1: i32) -> (i32, i32, i32) {
    %c0_i32 = arith.constant 0 : i32
    %c0_i32_0 = arith.constant 0 : i32
    return %arg0, %arg1, %c0_i32 : i32, i32, i32
  }
  func.func @transform_1(%arg0: i32, %arg1: i32) -> (i32, i32, i32) {
    %c0_i32 = arith.constant 0 : i32
    %c0_i32_0 = arith.constant 0 : i32
    %c0_i32_1 = arith.constant 0 : i32
    return %arg0, %c0_i32, %c0_i32_0 : i32, i32, i32
  }
  func.func @transform_2(%arg0: i32, %arg1: i32) -> (i32, i32, i32) {
    %c0_i32 = arith.constant 0 : i32
    %c0_i32_0 = arith.constant 0 : i32
    %c0_i32_1 = arith.constant 0 : i32
    return %arg0, %c0_i32, %c0_i32_0 : i32, i32, i32
  }
  func.func @transform_3(%arg0: i32, %arg1: i32) -> (i32, i32, i32) {
    %c0_i32 = arith.constant 0 : i32
    %c0_i32_0 = arith.constant 0 : i32
    return %arg0, %arg1, %c0_i32 : i32, i32, i32
  }
  func.func @transform_4(%arg0: i32, %arg1: i32) -> (i32, i32, i32) {
    %c0_i32 = arith.constant 0 : i32
    %c0_i32_0 = arith.constant 0 : i32
    return %arg0, %arg1, %c0_i32 : i32, i32, i32
  }
  func.func @transform_5(%arg0: i32, %arg1: i32) -> (i32, i32, i32) {
    %c0_i32 = arith.constant 0 : i32
    %c0_i32_0 = arith.constant 0 : i32
    return %arg0, %arg1, %c0_i32 : i32, i32, i32
  }
}

</mosaic_0001>

<bundles_post_ra>
// kernel: tpu_custom_call.1
= control target key start
LH: loop header
LB: loop body
LE: loop exit
PB: predicated region body
PF: predicated region fallthrough
CT: control target
= control target key end

     0   :  { %s1713_s0 = inlined_call_operand.hbm [shape: f32[4,8,32], index: 0, kind: input, shape index: {}]   ;;  %s1714_s1 = inlined_call_operand.hbm [shape: f32[4,8,32], index: 1, kind: input, shape index: {}]   ;;  %s1715_s2 = inlined_call_operand.hbm [shape: f32[4,8,32], index: 2, kind: input, shape index: {}]   ;;  %s1716_s3 = inlined_call_operand.hbm [shape: s8[4,8,8], index: 3, kind: input, shape index: {}]   ;;  %s1717_s4 = inlined_call_operand.hbm [shape: f32[4,8,32], index: 4, kind: output, shape index: {0}]   ;;  %s1718_s5 = inlined_call_operand.hbm [shape: f32[4,8,8], index: 5, kind: output, shape index: {1}]  }
   0x1   :  { %1726 = sst [smem:[#allocation23_spill]] %s1714_s1 }
   0x2   :  { %1727 = sst [smem:[#allocation24_spill]] %s1717_s4 }
   0x3   :  { %11 = vsyncpa [#allocation3], 0 }
   0x4   :  { %13 = vsyncpa [#allocation3 + $0x1], 0 }
   0x5   :  { %14 = vsyncpa [#allocation6], 0 }
   0x6   :  { %16 = vsyncpa [#allocation6 + $0x1], 0 }
   0x7   :  { %17 = vsyncpa [#allocation9], 0 }
   0x8   :  { %19 = vsyncpa [#allocation9 + $0x1], 0 }
   0x9   :  { %20 = vsyncpa [#allocation4], 0 }
   0xa   :  { %22 = vsyncpa [#allocation4 + $0x1], 0 }
   0xb   :  { %23 = vsyncpa [#allocation12], 0 }
   0xc   :  { %25 = vsyncpa [#allocation12 + $0x1], 0  ;;  %s1418_s18 = smov 0   ;;  %s1420_s19 = smov 0  }
   0xd   :  { %s1422_s20 = smov 0   ;;  %s1424_s21 = smov 0  }
   0xe   :  { %s1426_s22 = smov 0   ;;  %s1428_s23 = smov 0  }
   0xf LB: > { %1728 = sst [smem:[#allocation18_spill]] %s1351_s18  ;;  %s1449_s24 = sadd.s32 4294967295, %s1371_s23   ;;  %s1371_s23 = sphi %s1428_s23, %s31_s23   ;;  %s1367_s22 = sphi %s1426_s22, %s1751_s22   ;;  %s1363_s21 = sphi %s1424_s21, %s1750_s21   ;;  %s1359_s20 = sphi %s1422_s20, %s1746_s20   ;;  %s1355_s19 = sphi %s1420_s19, %s1749_s19   ;;  %s1351_s18 = sphi %s1418_s18, %s1748_s18  }
  0x10   : > { %1729 = sst [smem:[#allocation19_spill]] %s1359_s20  ;;  %s972_s25 = sadd.s32 4294967294, %s1371_s23  }
  0x11   : > { %s43_s26 = sadd.s32 1, %s1367_s22  ;;  %s52_s27 = sadd.s32 1, %s1359_s20 }
  0x12   : > { %p45_p0 = scmp.ge.s32.totalorder %s43_s26, 2  ;;  %p59_p1 = scmp.ne.s32.totalorder %s1359_s20, %s1355_s19 }
  0x13   : > { %p60_p2 = scmp.eq.s32.totalorder %s1371_s23, 0  ;;  %p65_p3 = scmp.ne.s32.totalorder %s1355_s19, %s1351_s18 }
  0x14   : > { %s1753_s26 = smov (%p45_p0, %s43_s26), 0  ;;  %p66_p5 = scmp.eq.s32.totalorder %s1449_s24, 0 }
  0x15   : > { %1730 = sst [smem:[#allocation20_spill]] %s1753_s26  ;;  %p1461_p4 = por %p60_p2, %p59_p1 }
  0x16   : > { %s47_s29 = ssub.s32 %s1367_s22, %s1753_s26  ;;  %p171_p6 = scmp.eq.s32.totalorder %s1449_s24, 1 }
  0x17   : > { %p50_p7 = scmp.eq.s32.totalorder %s47_s29, 0  ;;  %p1469_p8 = por %p66_p5, %p65_p3 }
  0x18   : > { %p1473_p9 = por %p171_p6, %p59_p1  ;;  %p177_p10 = scmp.eq.s32.totalorder %s972_s25, 1 }
  0x19   : > { %s1478_s7 = scalar_select %p50_p7, %s1359_s20, %s52_s27  }
  0x1a   : > { %p1480_p11 = por %p177_p10, %p65_p3  ;;  %p1074_p13 = scmp.lt.s32.totalorder %s1371_s23, 2 }
  0x1b   : > { %1734 = sst [smem:[#allocation21_spill]] %s1478_s7  ;;  %s1487_s9 = sand.u32 1, %s1359_s20  }
  0x1c   : > { %s1735_s8 = scalar_select %p1480_p11, 1, 0 }
  0x1d   : > { %s1490_s10 = sshll.u32 %s1487_s9, 4  ;;  %s1493_s11 = sshll.u32 %s1367_s22, 8 }
  0x1e   : > { %1736 = sst [smem:[#allocation22_spill]] %s1735_s8  ;;  %p1497_p0 = pnand %p1074_p13, %p1461_p4 }
  0x1f   : > { %s247_s13 = sand.u32 1, %s1371_s23   ;;  %s1738_s1 = sld [smem:[#allocation23_spill]] }
  0x20   : > { %s251_s17 = scalar_lea.vmem [#allocation5], %s1490_s10  ;;  %p987_p1 = scmp.ge.s32.totalorder %s1371_s23, 1 }
  0x21   : > { %s258_s25 = sshll.u32 %s251_s17, 4  ;;  %p309_p2 = scmp.lt.s32.totalorder %s1371_s23, 3  ;;  %s259_s25 = int_to_ptr.vmem [resolvable:$true] %s258_s25 }
  0x22   : > { %s1509_s27 = scalar_lea.sflag [#allocation6], %s247_s13  ;;  %p1143_p3 = pneg %p1497_p0 }
  0x23   : > { %s1154_s28 = scalar_lea.vmem %s259_s25, 256  ;;  %s1373_s29 = smov [#allocation5]  }
  0x24   : > { %p1155_p4 = scmp.ne.s32.totalorder %s259_s25, %s1154_s28  ;;  %s1159_s26 = sshll.u32 %s1373_s29, 4  ;;  %s1160_s26 = int_to_ptr.vmem [resolvable:$false] %s1159_s26 }
  0x25   : > { %s257_s16 = scalar_lea.hbm %s1738_s1, %s1493_s11  ;;  %s1161_s14 = scalar_lea.vmem %s1160_s26, 512 }
  0x26   : > { %p1157_p5 = pnand %p1155_p4, %p1143_p3  ;;  %p1162_p7 = scmp.lt.s32.totalorder %s259_s25, %s1160_s26 }
  0x27   : > { %p1163_p10 = scmp.lt.s32.totalorder %s1161_s14, %s1154_s28 }
  0x28   : > { %p1158_p6 = pneg %p1157_p5 }
  0x29   : > { %p1164_p13 = por %p1163_p10, %p1162_p7 }
  0x2b   : > { %p1165_p12 = pnand %p1164_p13, %p1158_p6 }
  0x2d   : > { %1168 = shalt.err (!%p1165_p12)
}
  0x2e   : > { %s1724_s15 = smov 128   ;;  %s1375_s13 = smov 8  }
  0x2f   : > { %1060 = dma.hbm_to_vmem [thread:$0]  (!%p1497_p0), %s257_s16, 256, %s259_s25, %s1509_s27, %s1724_s15, %s1724_s15, %s1375_s13  }
  0x30   : > { %p1526_p4 = pnand %p987_p1, %p309_p2  ;;  %s236_s29 = scalar_lea.hbm %s1713_s0, %s1493_s11 }
  0x31   : > { %s229_s14 = scalar_lea.vmem [#allocation2], %s1490_s10  ;;  %s278_s8 = scalar_lea.hbm %s1715_s2, %s1493_s11 }
  0x32   : > { %s237_s1 = sshll.u32 %s229_s14, 4  ;;  %s226_s18 = scalar_lea.sflag [#allocation3], %s1487_s9  ;;  %s238_s1 = int_to_ptr.vmem [resolvable:$true] %s237_s1 }
  0x33   : > { %s1182_s4 = scalar_lea.vmem %s238_s1, 256  ;;  %s1376_s16 = smov [#allocation2]  }
  0x34   : > { %p1183_p12 = scmp.ne.s32.totalorder %s238_s1, %s1182_s4  ;;  %s1187_s25 = sshll.u32 %s1376_s16, 4  ;;  %s1188_s25 = int_to_ptr.vmem [resolvable:$false] %s1187_s25 }
  0x35   : > { %s1189_s15 = scalar_lea.vmem %s1188_s25, 512  ;;  %p1190_p5 = scmp.lt.s32.totalorder %s238_s1, %s1188_s25 }
  0x36   : > { %p1185_p1 = pnand %p1183_p12, %p1143_p3  ;;  %p1191_p6 = scmp.lt.s32.totalorder %s1189_s15, %s1182_s4 }
  0x38   : > { %p1186_p2 = pneg %p1185_p1  ;;  %p1192_p7 = por %p1191_p6, %p1190_p5 }
  0x3a   : > { %p1193_p10 = pnand %p1192_p7, %p1186_p2 }
  0x3c   : > { %1196 = shalt.err (!%p1193_p10)
}
  0x3d   : > { %s1740_s20 = smov 128   ;;  %s272_s7 = scalar_lea.vmem [#allocation7], %s1490_s10 }
  0x3e   : > { %1057 = dma.hbm_to_vmem [thread:$0]  (!%p1497_p0), %s236_s29, 256, %s238_s1, %s226_s18, %s1740_s20, %s1740_s20, %s1375_s13  }
  0x3f   : > { %s279_s17 = sshll.u32 %s272_s7, 4  ;;  %s984_s28 = sshll.u32 %s1487_s9, 2  ;;  %s280_s17 = int_to_ptr.vmem [resolvable:$true] %s279_s17 }
  0x40   : > { %s1210_s14 = scalar_lea.vmem %s280_s17, 256  ;;  %s1377_s4 = smov [#allocation7]  }
  0x41   : > { %p1211_p13 = scmp.ne.s32.totalorder %s280_s17, %s1210_s14  ;;  %s1215_s15 = sshll.u32 %s1377_s4, 4  ;;  %s1216_s15 = int_to_ptr.vmem [resolvable:$false] %s1215_s15 }
  0x42   : > { %s1217_s16 = scalar_lea.vmem %s1216_s15, 512  ;;  %p1218_p2 = scmp.lt.s32.totalorder %s280_s17, %s1216_s15 }
  0x43   : > { %p1213_p12 = pnand %p1211_p13, %p1143_p3  ;;  %p1219_p5 = scmp.lt.s32.totalorder %s1217_s16, %s1210_s14 }
  0x45   : > { %p1214_p1 = pneg %p1213_p12  ;;  %p1220_p6 = por %p1219_p5, %p1218_p2 }
  0x47   : > { %p1221_p7 = pnand %p1220_p6, %p1214_p1 }
  0x49   : > { %1224 = shalt.err (!%p1221_p7)
}
  0x4a   : > { %1063 = dma.hbm_to_vmem [thread:$0]  (!%p1497_p0), %s278_s8, 256, %s280_s17, %s1509_s27, %s1740_s20, %s1740_s20, %s1375_s13  }
  0x4b   : > { %s1011_s10 = sshll.u32 %s1367_s22, 6  ;;  %s293_s14 = scalar_lea.vmem [#allocation8], %s984_s28 }
  0x4c   : > { %s300_s7 = scalar_lea.hbm %s1716_s3, %s1011_s10  ;;  %s301_s4 = sshll.u32 %s293_s14, 4  ;;  %s302_s4 = int_to_ptr.vmem [resolvable:$true] %s301_s4 }
  0x4d   : > { %s290_s15 = scalar_lea.sflag [#allocation9], %s1487_s9  ;;  %s1238_s16 = scalar_lea.vmem %s302_s4, 64 }
  0x4e   : > { %p1239_p10 = scmp.ne.s32.totalorder %s302_s4, %s1238_s16  ;;  %s1378_s11 = smov [#allocation8]  }
  0x4f   : > { %s1243_s1 = sshll.u32 %s1378_s11, 4  ;;  %s1244_s1 = int_to_ptr.vmem [resolvable:$false] %s1243_s1 }
  0x50   : > { %p1241_p13 = pnand %p1239_p10, %p1143_p3  ;;  %s1245_s18 = scalar_lea.vmem %s1244_s1, 128 }
  0x51   : > { %p1246_p1 = scmp.lt.s32.totalorder %s302_s4, %s1244_s1  ;;  %p1247_p2 = scmp.lt.s32.totalorder %s1245_s18, %s1238_s16 }
  0x52   : > { %p1242_p12 = pneg %p1241_p13 }
  0x53   : > { %p1248_p5 = por %p1247_p2, %p1246_p1 }
  0x55   : > { %p1249_p6 = pnand %p1248_p5, %p1242_p12 }
  0x57   : > { %1252 = shalt.err (!%p1249_p6)
}
  0x58   : > { %s1379_s8 = smov 32   ;;  %s1380_s27 = smov 2  }
  0x59   : > { %1066 = dma.hbm_to_vmem [thread:$0]  (!%p1497_p0), %s300_s7, 64, %s302_s4, %s290_s15, %s1379_s8, %s1379_s8, %s1380_s27  }
  0x5a   : > { %313 = sbr.rel (%p1526_p4) target bundleno = 827 (0x33b), region = 36  ;;  %s1577_s9 = sand.u32 (!%p1526_p4), 1, %s1355_s19  }
  0x5b   : > { %s1580_s13 = sshll.u32 (!%p1526_p4), %s1577_s9, 4  ;;  %s316_s20 = scalar_lea.sflag (!%p1526_p4), [#allocation3], %s1577_s9 }
  0x5c   : > { %s319_s17 = scalar_lea.vmem (!%p1526_p4), [#allocation2], %s1580_s13 }
  0x5f   : > { %1330 = dma.done.wait (%p1469_p8), %s316_s20, 256  }
  0x60   : > { %1332 = vsyncadd (%p1469_p8), %s316_s20, 4294967040  ;;  %s324_s12 = sand.u32 1, %s1449_s24   ;;  %s328_s28 = scalar_lea.vmem [#allocation5], %s1580_s13 }
  0x61   : > { %s325_s26 = scalar_lea.sflag [#allocation6], %s324_s12 }
  0x62   : > { %1334 = dma.done.wait (%p1469_p8), %s325_s26, 512  }
  0x63   : > { %1336 = vsyncadd (%p1469_p8), %s325_s26, 4294966784  ;;  %s991_s10 = sshll.u32 %s1577_s9, 2  ;;  %s337_s29 = scalar_lea.vmem [#allocation7], %s1580_s13 }
  0x64   : > { %s343_s25 = scalar_lea.sflag [#allocation9], %s1577_s9  ;;  %s346_s7 = scalar_lea.vmem [#allocation8], %s991_s10 }
  0x65   : > { %1338 = dma.done.wait (%p1469_p8), %s343_s25, 64  }
  0x66   : > { %1340 = vsyncadd (%p1469_p8), %s343_s25, 4294967232  ;;  %v1381_v0 = vmov 0.0   ;;  %vm1382_vm0 = vmmov 0   ;;  %vm409_vm1 = vcmask 261120   ;;  %v403_v1 = vld [vmem:[%s328_s28] sm:$0xff]  ;;  %v404_v2 = vld [vmem:[%s328_s28 + $0x8] sm:$0xff] }
  0x67   : > { %1022 = vmatprep.subr.mxu0 %v1381_v0  ;;  %1027 = vmatprep.subr.mxu1 %v1381_v0  ;;  %v401_v3 = vld [vmem:[%s319_s17] sm:$0xff]  ;;  %v402_v4 = vld [vmem:[%s319_s17 + $0x8] sm:$0xff]  ;;  %v1383_v7 = vmov 0   ;;  %vm574_vm6 = vcmask 64512   ;;  %s392_s24 = scalar_lea.vmem [#allocation11], %s1580_s13  ;;  %s1012_s30 = sshll.u32 %s1363_s21, 8 }
  0x68   : > { %1024 = vmatprep.mubr.msk.f32.mxu0 %vm1382_vm0, %v1381_v0  ;;  %1029 = vmatprep.mubr.msk.f32.mxu1 %vm1382_vm0, %v1381_v0  ;;  %v407_v5 = vld [vmem:[%s346_s7] sm:$0x3]  ;;  %v408_v6 = vld [vmem:[%s346_s7 + $0x2] sm:$0x3]  ;;  %v406_v33 = vld [vmem:[%s337_s29 + $0x8] sm:$0xff]  ;;  %s784_s14 = sshll.u32 %s392_s24, 4  ;;  %s1624_s16 = scalar_lea.hbm %s1718_s5, %s1012_s30  ;;  %s1626_s14 = int_to_ptr.vmem [resolvable:$true] %s784_s14 }
  0x69   : > { %1023 = vmatpush3.xpose.msk.msra.mxu0 %vm409_vm1, %v403_v1  ;;  %1028 = vmatpush3.xpose.msk.msra.mxu1 %vm409_vm1, %v404_v2  ;;  %vm564_vm2 = vnez %v407_v5  ;;  %vm565_vm3 = vnez %v408_v6  ;;  %v405_v32 = vld [vmem:[%s337_s29] sm:$0xff]  ;;  %s753_s11 = scalar_lea.sflag [#allocation12], %s1577_s9  ;;  %s1253_s1 = scalar_lea.vmem %s1626_s14, 256 }
  0x6a   : > { %1032 = vmatprep.subr.mxu0 %v1381_v0  ;;  %1037 = vmatprep.subr.mxu1 %v1381_v0  ;;  %v566_v8 = vsel %vm564_vm2, 16843009, %v1383_v7  ;;  %v567_v9 = vsel %vm565_vm3, 16843009, %v1383_v7  ;;  %p1254_p8 = scmp.ne.s32.totalorder %s1626_s14, %s1253_s1  ;;  %s1384_s18 = smov [#allocation11]  }
  0x6b   : > { %v568_v10 = vunpack.c.0.s8 %v566_v8  ;;  %v569_v11 = vunpack.c.0.s8 %v567_v9  ;;  %s1257_s8 = sshll.u32 %s1384_s18, 4  ;;  %s1258_s8 = int_to_ptr.vmem [resolvable:$false] %s1257_s8 }
  0x6c   : > { %1025 = vmatmul.mubr.msk.f32.vlgmr.msra.gmra.mxu0 %vm409_vm1, %v401_v3  ;;  %1030 = vmatmul.mubr.msk.f32.vlgmr.msra.gmra.mxu1 %vm409_vm1, %v402_v4  ;;  %p1255_p0 = pnand %p1254_p8, %p1473_p9  ;;  %s1259_s27 = scalar_lea.vmem %s1258_s8, 512 }
  0x6d   : > { %1034 = vmatprep.mubr.msk.f32.mxu0 %vm1382_vm0, %v1381_v0  ;;  %1039 = vmatprep.mubr.msk.f32.mxu1 %vm1382_vm0, %v1381_v0  ;;  %vm570_vm4 = vcmp.ne.s32.totalorder %v568_v10, 0  ;;  %vm571_vm5 = vcmp.ne.s32.totalorder %v569_v11, 0  ;;  %p1260_p4 = scmp.lt.s32.totalorder %s1626_s14, %s1258_s8  ;;  %p1261_p7 = scmp.lt.s32.totalorder %s1259_s27, %s1253_s1 }
  0x6e   : > { %1033 = vmatpush3.msra.mxu0 %v405_v32  ;;  %1038 = vmatpush3.msra.mxu1 %v406_v33  ;;  %p1256_p3 = pneg %p1255_p0 }
  0x6f   : > { %p1262_p10 = por %p1261_p7, %p1260_p4 }
  0x71   : > { %p1263_p13 = pnand %p1262_p10, %p1256_p3 }
 0x12c   : > { %v482_v12 = vpop.f32.mrf.mxu0  ;;  %v558_v13 = vpop.f32.mrf.mxu1 }
 0x12d   : > { %v562_v14 = vmul.f32 0.17677669, %v482_v12  ;;  %v563_v15 = vmul.f32 0.17677669, %v558_v13 }
 0x12e   : > { %v1026_v16 = vpop.f32.mrf.mxu0  ;;  %v1031_v17 = vpop.f32.mrf.mxu1 }
 0x12f   : > { %v572_v18 = vsel %vm570_vm4, 0.0, %v562_v14  ;;  %v573_v19 = vsel %vm571_vm5, 0.0, %v563_v15 }
 0x130   : > { %v575_v20 = vsel %vm574_vm6, %v572_v18, -inf  ;;  %v578_v21 = vsel %vm574_vm6, %v573_v19, -inf }
 0x131   : > { %576 = vmax.xlane.f32.xlu0 %v575_v20 }
 0x135   : > { %579 = vmax.xlane.f32.xlu0 %v578_v21 }
 0x1ba   : > { %v577_v22 = vpop.xlane.xlu0 %576 }
 0x1bb   : > { %v581_v23 = vsub.f32 %v572_v18, %v577_v22 }
 0x1bd   : > { %v583_v24 = vmul.f32 1.442695, %v581_v23 }
 0x1be   : > { %v580_v25 = vpop.xlane.xlu0 %579 }
 0x1bf   : > { %1133 = vpow2.f32 %v583_v24  ;;  %v582_v26 = vsub.f32 %v573_v19, %v580_v25 }
 0x1c1   : > { %v585_v27 = vmul.f32 1.442695, %v582_v26 }
 0x1c3   : > { %1135 = vpow2.f32 %v585_v27 }
 0x1cc   : > { %v1134_v28 = vpop.eup %1133 }
 0x1cd   : > { %v587_v29 = vsel %vm574_vm6, %v1134_v28, 0.0 }
 0x1ce   : > { %588 = vadd.xlane.f32.xlu1 %v587_v29 }
 0x1d0   : > { %v1136_v30 = vpop.eup %1135 }
 0x1d1   : > { %v590_v31 = vsel %vm574_vm6, %v1136_v30, 0.0 }
 0x1d2   : > { %591 = vadd.xlane.f32.xlu1 %v590_v31 }
 0x257   : > { %v589_v34 = vpop.xlane.xlu1 %588 }
 0x258   : > { %1137 = vrcp.f32 %v589_v34 }
 0x25b   : > { %v592_v35 = vpop.xlane.xlu1 %591 }
 0x25c   : > { %1139 = vrcp.f32 %v592_v35 }
 0x265   : > { %v1138_v36 = vpop.eup %1137 }
 0x266   : > { %v595_v37 = vmul.f32 %v1138_v36, %v1134_v28 }
 0x268   : > { %1035 = vmatmul.mubr.msk.f32.vlgmr.msra.gmra.mxu0 %vm574_vm6, %v595_v37  ;;  %597 = vst.msk [vmem:[%s392_s24] sm:$0xff] %vm574_vm6, %v595_v37 }
 0x269   : > { %v1140_v38 = vpop.eup %1139 }
 0x26a   : > { %v596_v39 = vmul.f32 %v1140_v38, %v1136_v30 }
 0x26c   : > { %1040 = vmatmul.mubr.msk.f32.vlgmr.msra.gmra.mxu1 %vm574_vm6, %v596_v39  ;;  %598 = vst.msk [vmem:[%s392_s24 + $0x8] sm:$0xff] %vm574_vm6, %v596_v39 }
 0x26d   : > { %1266 = shalt.err (!%p1263_p13)
}
 0x26e   : > { %s1267_s20 = scalar_lea.hbm %s1624_s16, 256  ;;  %s1271_s26 = scalar_lea.hbm %s1718_s5, 512 }
 0x26f   : > { %p1268_p12 = scmp.ne.s32.totalorder %s1624_s16, %s1267_s20  ;;  %p1272_p5 = scmp.lt.s32.totalorder %s1624_s16, %s1718_s5 }
 0x270   : > { %p1273_p6 = scmp.lt.s32.totalorder %s1271_s26, %s1267_s20 }
 0x271   : > { %p1269_p1 = pnand %p1268_p12, %p1473_p9 }
 0x272   : > { %p1274_p8 = por %p1273_p6, %p1272_p5 }
 0x273   : > { %p1270_p2 = pneg %p1269_p1 }
 0x275   : > { %p1275_p0 = pnand %p1274_p8, %p1270_p2 }
 0x277   : > { %1278 = shalt.err (!%p1275_p0)
}
 0x278   : > { %s1385_s29 = smov 128   ;;  %s1386_s25 = smov 8  }
 0x279   : > { %1051 = dma.vmem_to_hbm [thread:$0]  (%p1473_p9), %s1626_s14, 256, %s1624_s16, %s753_s11, %s1385_s29, %s1385_s29, %s1386_s25  }
 0x27a   : > { %s385_s7 = scalar_lea.vmem [#allocation10], %s1580_s13  ;;  %s1741_s1 = sld [smem:[#allocation24_spill]] }
 0x27b   : > { %s767_s24 = sshll.u32 %s385_s7, 4  ;;  %s748_s13 = scalar_lea.sflag [#allocation4], %s1577_s9  ;;  %s1656_s24 = int_to_ptr.vmem [resolvable:$true] %s767_s24 }
 0x27c   : > { %s1279_s14 = scalar_lea.vmem %s1656_s24, 256  ;;  %s1387_s16 = smov [#allocation10]  }
 0x27d   : > { %p1280_p3 = scmp.ne.s32.totalorder %s1656_s24, %s1279_s14  ;;  %s1283_s11 = sshll.u32 %s1387_s16, 4  ;;  %s1284_s11 = int_to_ptr.vmem [resolvable:$false] %s1283_s11 }
 0x27e   : > { %s1285_s8 = scalar_lea.vmem %s1284_s11, 512  ;;  %p1286_p10 = scmp.lt.s32.totalorder %s1656_s24, %s1284_s11 }
 0x27f   : > { %p1281_p4 = pnand %p1280_p3, %p1473_p9  ;;  %p1287_p13 = scmp.lt.s32.totalorder %s1285_s8, %s1279_s14 }
 0x280   : > { %s1663_s18 = scalar_lea.hbm %s1741_s1, %s1012_s30 }
 0x281   : > { %p1282_p7 = pneg %p1281_p4  ;;  %p1288_p12 = por %p1287_p13, %p1286_p10 }
 0x283   : > { %p1289_p1 = pnand %p1288_p12, %p1282_p7 }
 0x328   : > { %v668_v40 = vpop.f32.mrf.mxu0 }
 0x329   : > { %745 = vst.msk [vmem:[%s385_s7] sm:$0xff] %vm409_vm1, %v668_v40 }
 0x32a   : > { %v1036_v41 = vpop.f32.mrf.mxu0 }
 0x32c   : > { %v741_v42 = vpop.f32.mrf.mxu1 }
 0x32d   : > { %746 = vst.msk [vmem:[%s385_s7 + $0x8] sm:$0xff] %vm409_vm1, %v741_v42 }
 0x32e   : > { %v1041_v43 = vpop.f32.mrf.mxu1 }
 0x32f   : > { %1292 = shalt.err (!%p1289_p1)
}
 0x330   : > { %s1293_s21 = scalar_lea.hbm %s1663_s18, 256  ;;  %s1297_s27 = scalar_lea.hbm %s1741_s1, 512 }
 0x331   : > { %p1294_p2 = scmp.ne.s32.totalorder %s1663_s18, %s1293_s21  ;;  %p1298_p8 = scmp.lt.s32.totalorder %s1663_s18, %s1741_s1 }
 0x332   : > { %p1299_p0 = scmp.lt.s32.totalorder %s1297_s27, %s1293_s21 }
 0x333   : > { %p1295_p5 = pnand %p1294_p2, %p1473_p9 }
 0x334   : > { %p1300_p3 = por %p1299_p0, %p1298_p8 }
 0x335   : > { %p1296_p6 = pneg %p1295_p5 }
 0x337   : > { %p1301_p4 = pnand %p1300_p3, %p1296_p6 }
 0x339   : > { %1304 = shalt.err (!%p1301_p4)
}
 0x33a   : > { %1050 = dma.vmem_to_hbm [thread:$0]  (%p1473_p9), %s1656_s24, 256, %s1663_s18, %s748_s13, %s1385_s29, %s1385_s29, %s1386_s25  }
 0x33b PF: > { %s1742_s12 = sld [smem:[#allocation18_spill]]  ;;  %p1744_p7 = scmp.ge.s32.totalorder %s1371_s23, 2 }
 0x33d   : > { %p1068_p10 = pnand %p1744_p7, %p1480_p11 }
 0x33f   : > { %p1069_p13 = pneg %p1068_p10 }
 0x341   : > { %s799_s28 = sand.u32 1, %s1742_s12  }
 0x342   : > { %s800_s10 = scalar_lea.sflag [#allocation4], %s799_s28 }
 0x343   : > { %1342 = dma.done.wait (%p1069_p13), %s800_s10, 256  }
 0x344   : > { %1344 = vsyncadd (%p1069_p13), %s800_s10, 4294967040  ;;  %s809_s7 = scalar_lea.sflag [#allocation12], %s799_s28 }
 0x345   : > { %1346 = dma.done.wait (%p1069_p13), %s809_s7, 256  }
 0x346   : > { %1348 = vsyncadd (%p1069_p13), %s809_s7, 4294967040  ;;  %s31_s23 = sadd.s32 1, %s1371_s23   ;;  %s1745_s6 = sld [smem:[#allocation19_spill]] }
 0x347   : > { %p28_p12 = scmp.ge.s32.totalorder %s31_s23, 4   ;;  %s1746_s20 = sld [smem:[#allocation21_spill]] }
 0x348   : > { %s1747_s29 = sld [smem:[#allocation20_spill]]  ;;  %s1748_s18 = smov %s1355_s19 }
 0x349   : > { %s1750_s21 = smov %s1367_s22 }
 0x34a   :  { %30 = sbr.rel (!%p28_p12) target bundleno = 15 (0xf), region = 135 }
 0x34c   : > { %s1749_s19 = smov %s1745_s6 }
 0x34e   : > { %s1751_s22 = smov %s1747_s29 }
 0x34f   :  { %814 = vsyncpa [#allocation3], 1 }
 0x350   :  { %816 = vsyncpa [#allocation3 + $0x1], 1 }
 0x351   :  { %817 = vsyncpa [#allocation6], 1 }
 0x352   :  { %819 = vsyncpa [#allocation6 + $0x1], 1 }
 0x353   :  { %820 = vsyncpa [#allocation9], 1 }
 0x354   :  { %822 = vsyncpa [#allocation9 + $0x1], 1 }
 0x355   :  { %823 = vsyncpa [#allocation4], 1 }
 0x356   :  { %825 = vsyncpa [#allocation4 + $0x1], 1 }
 0x357   :  { %826 = vsyncpa [#allocation12], 1 }
 0x358   :  { %828 = vsyncpa [#allocation12 + $0x1], 1 }

</bundles_post_ra>
